<compile_context>
chip_gen: v7x
topology: tpu7x:2x2x1
jax: 0.10.0
libtpu: 0.0.40
codegen_flags: <defaults>
</compile_context>

<pallas_src>
import functools

import jax
import jax.numpy as jnp
from jax.experimental import pallas as pl
from jax.experimental.pallas import tpu as pltpu


_LANES = 128
_VMEM_LIMIT = 32 * 1024 * 1024          # safe scoped-VMEM request on v5e/v6e/v7x
_TARGET_TILE_BYTES = 2 * 1024 * 1024    # per-stream, per-buffer tile size


def _choose_row_tile(rows, h, elem_bytes):
    """Largest multiple-of-8 row tile whose (tr, h) slab is <= the target bytes."""
    tr = (_TARGET_TILE_BYTES // max(1, h * elem_bytes)) // 8 * 8
    tr = max(8, tr)
    if tr >= rows:
        return rows  # full-extent block (always legal, any row count)
    return tr        # multiple of 8; ragged last block handled by Pallas masking


def _add_kernel(x_ref, y_ref, o_ref):
    o_ref[...] = x_ref[...] + y_ref[...]


def _add_ln_kernel(x_ref, y_ref, g_ref, b_ref, o_ref, *, eps):
    s = (x_ref[...] + y_ref[...]).astype(jnp.float32)
    h = s.shape[-1]
    mean = jnp.mean(s, axis=-1, keepdims=True)
    centered = s - mean
    # torch.std default is unbiased (ddof = 1); eps is added to std, not var.
    var = jnp.sum(centered * centered, axis=-1, keepdims=True) / (h - 1)
    inv = pl.reciprocal(jnp.sqrt(var) + eps, approx=False)  # exact: eps=1e-12 paths
    g = g_ref[...].astype(jnp.float32)
    b = b_ref[...].astype(jnp.float32)
    o_ref[...] = ((centered * inv) * g + b).astype(o_ref.dtype)


class AddPallas:
    """Pallas equivalent of the PyTorch Add module."""

    def __init__(self, hsize, norm=False, eps=1e-12, dtype=jnp.float32):
        self.hsize = hsize
        self.norm = norm
        self.eps = eps
        if norm:
            # Deterministic init matching nn.Parameter(torch.ones/zeros(size))
            self.gamma = jnp.ones((1, hsize), dtype=dtype)
            self.beta = jnp.zeros((1, hsize), dtype=dtype)

    def __call__(self, x, y):
        assert x.shape == y.shape
        if self.norm:
            return self._add_norm(x, y)
        return self._add(x, y)

    # ---------- norm=False: lane-dense streaming add ----------
    def _add(self, x, y):
        orig_shape = x.shape
        total = x.size
        elem_bytes = jnp.dtype(x.dtype).itemsize

        xf = x.reshape(-1)
        yf = y.reshape(-1)
        pad = (-total) % _LANES
        if pad:
            xf = jnp.pad(xf, (0, pad))
            yf = jnp.pad(yf, (0, pad))
        rows = (total + pad) // _LANES
        x2 = xf.reshape(rows, _LANES)
        y2 = yf.reshape(rows, _LANES)

        tr = _choose_row_tile(rows, _LANES, elem_bytes)
        grid = (pl.cdiv(rows, tr),)

        out = pl.pallas_call(
            _add_kernel,
            out_shape=jax.ShapeDtypeStruct((rows, _LANES), x.dtype),
            grid=grid,
            in_specs=[
                pl.BlockSpec((tr, _LANES), lambda i: (i, 0)),
                pl.BlockSpec((tr, _LANES), lambda i: (i, 0)),
            ],
            out_specs=pl.BlockSpec((tr, _LANES), lambda i: (i, 0)),
            compiler_params=pltpu.CompilerParams(
                dimension_semantics=("parallel",),
                vmem_limit_bytes=_VMEM_LIMIT,
            ),
        )(x2, y2)

        out = out.reshape(-1)
        if pad:
            out = out[:total]
        return out.reshape(orig_shape)

    # ---------- norm=True: add + LayerNorm over the last (hidden) axis ----------
    def _add_norm(self, x, y):
        orig_shape = x.shape
        h = orig_shape[-1]
        assert h == self.hsize
        rows = x.size // h
        elem_bytes = jnp.dtype(x.dtype).itemsize

        x2 = x.reshape(rows, h)
        y2 = y.reshape(rows, h)

        # Account for the f32 accumulation footprint inside the kernel.
        tr = _choose_row_tile(rows, h, max(elem_bytes, 4))
        grid = (pl.cdiv(rows, tr),)

        kernel = functools.partial(_add_ln_kernel, eps=self.eps)
        out = pl.pallas_call(
            kernel,
            out_shape=jax.ShapeDtypeStruct((rows, h), x.dtype),
            grid=grid,
            in_specs=[
                pl.BlockSpec((tr, h), lambda i: (i, 0)),
                pl.BlockSpec((tr, h), lambda i: (i, 0)),
                pl.BlockSpec((1, h), lambda i: (0, 0)),   # gamma: resident
                pl.BlockSpec((1, h), lambda i: (0, 0)),   # beta: resident
            ],
            out_specs=pl.BlockSpec((tr, h), lambda i: (i, 0)),
            compiler_params=pltpu.CompilerParams(
                dimension_semantics=("parallel",),
                vmem_limit_bytes=_VMEM_LIMIT,
            ),
        )(x2, y2, self.gamma, self.beta)

        return out.reshape(orig_shape)


if __name__ == "__main__":
    # Small shapes consistent with the module: batch=2, seq=8, hidden(HSIZE)=32
    B, S, H = 2, 8, 32
    key = jax.random.PRNGKey(0)
    kx, ky = jax.random.split(key)
    x = jax.random.normal(kx, (B, S, H), dtype=jnp.float32)
    y = jax.random.normal(ky, (B, S, H), dtype=jnp.float32)

    # norm=False path
    add_plain = AddPallas(H, norm=False)
    out_plain = jax.block_until_ready(add_plain(x, y))

    # norm=True path (LayerNorm with torch-style unbiased std and eps added to std)
    add_norm = AddPallas(H, norm=True)
    out_norm = jax.block_until_ready(add_norm(x, y))

    # Reference checks in plain JAX
    ref_plain = x + y
    s = x + y
    mean = s.mean(-1, keepdims=True)
    std = jnp.sqrt(((s - mean) ** 2).sum(-1, keepdims=True) / (H - 1))
    ref_norm = 1.0 * (s - mean) / (std + 1e-12) + 0.0

    assert out_plain.shape == (B, S, H) and out_norm.shape == (B, S, H)
    assert jnp.allclose(out_plain, ref_plain, atol=1e-6)
    assert jnp.allclose(out_norm, ref_norm, atol=1e-5)

    print("KERNEL_OK")
</pallas_src>

<mosaic_0001>
module attributes {stable_mosaic.version = 11 : i64} {
  func.func @_add_kernel(%arg0: i32, %arg1: memref<4x128xf32, #tpu.memory_space<vmem>>, %arg2: memref<4x128xf32, #tpu.memory_space<vmem>>, %arg3: memref<4x128xf32, #tpu.memory_space<vmem>>) attributes {dimension_semantics = [#tpu.dimension_semantics<parallel>], iteration_bounds = array<i64: 1>, scalar_prefetch = 0 : i64, scratch_operands = 0 : i64, tpu.core_type = #tpu.core_type<tc>, window_params = [{transform_indices = @transform_0, window_bounds = array<i64: 4, 128>}, {transform_indices = @transform_1, window_bounds = array<i64: 4, 128>}, {transform_indices = @transform_2, window_bounds = array<i64: 4, 128>}]} {
    %c0 = arith.constant 0 : index
    %c0_0 = arith.constant 0 : index
    %0 = vector.load %arg1[%c0, %c0_0] : memref<4x128xf32, #tpu.memory_space<vmem>>, vector<4x128xf32>
    %c0_1 = arith.constant 0 : index
    %c0_2 = arith.constant 0 : index
    %1 = vector.load %arg2[%c0_1, %c0_2] : memref<4x128xf32, #tpu.memory_space<vmem>>, vector<4x128xf32>
    %2 = arith.addf %0, %1 : vector<4x128xf32>
    %c0_3 = arith.constant 0 : index
    %c0_4 = arith.constant 0 : index
    %3 = vector.load %arg3[%c0_3, %c0_4] : memref<4x128xf32, #tpu.memory_space<vmem>>, vector<4x128xf32>
    tpu.vector_store %arg3[%c0_3, %c0_4], %2 {strides = array<i32>} : memref<4x128xf32, #tpu.memory_space<vmem>>, vector<4x128xf32>,
    return
  }
  func.func @transform_0(%arg0: i32) -> (i32, i32) {
    %c0_i32 = arith.constant 0 : i32
    %c0_i32_0 = arith.constant 0 : i32
    return %arg0, %c0_i32 : i32, i32
  }
  func.func @transform_1(%arg0: i32) -> (i32, i32) {
    %c0_i32 = arith.constant 0 : i32
    %c0_i32_0 = arith.constant 0 : i32
    return %arg0, %c0_i32 : i32, i32
  }
  func.func @transform_2(%arg0: i32) -> (i32, i32) {
    %c0_i32 = arith.constant 0 : i32
    %c0_i32_0 = arith.constant 0 : i32
    return %arg0, %c0_i32 : i32, i32
  }
}

</mosaic_0001>

<bundles_post_ra>
// kernel: tpu_custom_call.1
= control target key start
LH: loop header
LB: loop body
LE: loop exit
PB: predicated region body
PF: predicated region fallthrough
CT: control target
= control target key end

     0   :  { %7 = vsyncpa [#allocation3], 0  ;;  %s185_s0 = inlined_call_operand.hbm [shape: f32[4,128], index: 0, kind: input, shape index: {}]   ;;  %s186_s1 = inlined_call_operand.hbm [shape: f32[4,128], index: 1, kind: input, shape index: {}]   ;;  %s187_s2 = inlined_call_operand.hbm [shape: f32[4,128], index: 2, kind: output, shape index: {}]  }
   0x1   :  { %8 = vsyncpa [#allocation6], 0 }
   0x2   :  { %9 = vsyncpa [#allocation4], 0  ;;  %s131_s9 = smov [#allocation2]   ;;  %s132_s11 = smov [#allocation5]  }
   0x3   :  { %s16_s10 = sshll.u32 %s131_s9, 4  ;;  %s26_s12 = sshll.u32 %s132_s11, 4  ;;  %s17_s10 = int_to_ptr.vmem [resolvable:$true] %s16_s10  ;;  %s27_s12 = int_to_ptr.vmem [resolvable:$true] %s26_s12 }
   0x4   :  { %s59_s15 = scalar_lea.hbm %s185_s0, 64 }
   0x5   :  { %p60_p0 = scmp.ne.s32.totalorder %s185_s0, %s59_s15  ;;  %p63_p1 = scmp.lt.u32.totalorder %s59_s15, %s185_s0 }
   0x7   :  { %p65_p2 = pnand %p63_p1, %p60_p0 }
   0x9   :  { %68 = shalt.err (!%p65_p2)
}
   0xa   :  { %s69_s20 = scalar_lea.vmem %s17_s10, 64  ;;  %p74_p4 = scmp.lt.s32.totalorder %s17_s10, %s17_s10 }
   0xb   :  { %p70_p3 = scmp.ne.s32.totalorder %s17_s10, %s69_s20  ;;  %p75_p5 = scmp.lt.s32.totalorder %s69_s20, %s69_s20 }
   0xd   :  { %p76_p6 = por %p75_p5, %p74_p4 }
   0xf   :  { %p77_p7 = pnand %p76_p6, %p70_p3 }
  0x11   :  { %80 = shalt.err (!%p77_p7)
}
  0x12   :  { %19 = dma.hbm_to_vmem [thread:$0]  %s185_s0, 64, %s17_s10, [#allocation3]  }
  0x13   :  { %s81_s25 = scalar_lea.hbm %s186_s1, 64 }
  0x14   :  { %p82_p8 = scmp.ne.s32.totalorder %s186_s1, %s81_s25  ;;  %p85_p9 = scmp.lt.u32.totalorder %s81_s25, %s186_s1 }
  0x16   :  { %p87_p10 = pnand %p85_p9, %p82_p8 }
  0x18   :  { %90 = shalt.err (!%p87_p10)
}
  0x19   :  { %s91_s30 = scalar_lea.vmem %s27_s12, 64  ;;  %p96_p12 = scmp.lt.s32.totalorder %s27_s12, %s27_s12 }
  0x1a   :  { %p92_p11 = scmp.ne.s32.totalorder %s27_s12, %s91_s30  ;;  %p97_p13 = scmp.lt.s32.totalorder %s91_s30, %s91_s30 }
  0x1c   :  { %p98_p0 = por %p97_p13, %p96_p12 }
  0x1e   :  { %p99_p1 = pnand %p98_p0, %p92_p11 }
  0x20   :  { %102 = shalt.err (!%p99_p1)
}
  0x21   :  { %29 = dma.hbm_to_vmem [thread:$0]  %s186_s1, 64, %s27_s12, [#allocation6]  }
  0x22   :  { %125 = dma.done.wait [#allocation3], 64  }
  0x23   :  { %126 = vsyncadd [#allocation3], 4294967232 }
  0x24   :  { %127 = dma.done.wait [#allocation6], 64  }
  0x25   :  { %128 = vsyncadd [#allocation6], 4294967232  ;;  %s133_s4 = smov [#allocation7]   ;;  %v36_v0 = vld [vmem:[#allocation2] sm:$0xf] }
  0x26   :  { %s46_s5 = sshll.u32 %s133_s4, 4  ;;  %v37_v1 = vld [vmem:[#allocation5] sm:$0xf]  ;;  %s47_s5 = int_to_ptr.vmem [resolvable:$true] %s46_s5 }
  0x27   :  { %v38_v2 = vadd.f32 %v37_v1, %v36_v0  ;;  %s103_s6 = scalar_lea.vmem %s47_s5, 64  ;;  %p108_p3 = scmp.lt.s32.totalorder %s47_s5, %s47_s5 }
  0x28   :  { %p104_p2 = scmp.ne.s32.totalorder %s47_s5, %s103_s6  ;;  %p109_p4 = scmp.lt.s32.totalorder %s103_s6, %s103_s6 }
  0x29   :  { %39 = vst [vmem:[#allocation7] sm:$0xf] %v38_v2 }
  0x2a   :  { %p110_p5 = por %p109_p4, %p108_p3 }
  0x2c   :  { %p111_p6 = pnand %p110_p5, %p104_p2 }
  0x2e   :  { %114 = shalt.err (!%p111_p6)
}
  0x2f   :  { %s115_s8 = scalar_lea.hbm %s187_s2, 64 }
  0x30   :  { %p116_p7 = scmp.ne.s32.totalorder %s187_s2, %s115_s8  ;;  %p119_p8 = scmp.lt.u32.totalorder %s115_s8, %s187_s2 }
  0x32   :  { %p121_p9 = pnand %p119_p8, %p116_p7 }
  0x34   :  { %124 = shalt.err (!%p121_p9)
}
  0x35   :  { %49 = dma.vmem_to_hbm [thread:$0]  %s47_s5, 64, %s187_s2, [#allocation4]  }
  0x36   :  { %129 = dma.done.wait [#allocation4], 64  }
  0x37   :  { %130 = vsyncadd [#allocation4], 4294967232 }
  0x38   :  { %53 = vsyncpa [#allocation3], 1 }
  0x39   :  { %54 = vsyncpa [#allocation6], 1 }
  0x3a   :  { %55 = vsyncpa [#allocation4], 1 }

</bundles_post_ra>
